<compile_context>
chip_gen: v7x
topology: tpu7x:2x2x1
jax: 0.10.0
libtpu: 0.0.40
codegen_flags: <defaults>
</compile_context>

<pallas_src>
import functools

import jax
import jax.numpy as jnp
from jax.experimental import pallas as pl
from jax.experimental.pallas import tpu as pltpu


def _round_up(x, m):
    return (x + m - 1) // m * m


# ---------------------------------------------------------------------------
# Fused kernel.
#   cls_ref : [tb, T]          pooled title embedding (per batch tile), f32
#   x_ref   : [S, tb, tk]      name vectors, K tile of the vocab (f32 or bf16)
#   wn_ref  : [tk, H] or [Vp,H] name2vec weight (K tile, or VMEM-resident full)
#   bn_ref  : [1, H]           name2vec bias, f32
#   wft_ref : [1, T]           fc weight rows for the title features, f32
#   wfn_ref : [S, 1, H]        fc weight rows for each name slot, f32
#   bfc_ref : [1, 1]           fc bias, f32
#   o_ref   : [tb, 1]          output, f32
#   acc_ref : [S, tb, H]       f32 VMEM accumulator across the K grid axis
# ---------------------------------------------------------------------------
def _fused_kernel(cls_ref, x_ref, wn_ref, bn_ref, wft_ref, wfn_ref, bfc_ref,
                  o_ref, acc_ref):
    k = pl.program_id(1)
    nk = pl.num_programs(1)

    @pl.when(k == 0)
    def _init():
        acc_ref[...] = jnp.zeros_like(acc_ref)

    S, tb, tk = x_ref.shape
    H = wn_ref.shape[1]

    # Free leading-dim merge (tb % 8 == 0): all 12 slots feed ONE MXU matmul
    # per K step -> single weight push, M = S*tb rows per push.
    xs2d = x_ref[...].reshape(S * tb, tk)

    if wn_ref.shape[0] == tk:
        # K-tiled weight stream (double-buffered by the BlockSpec pipeline).
        wn = wn_ref[...]
    else:
        # VMEM-resident full weight: slice the current K tile in-place.
        wn = wn_ref[pl.ds(pl.multiple_of(k * tk, 128), tk), :]

    part = jnp.dot(xs2d, wn, preferred_element_type=jnp.float32)   # [S*tb, H]
    acc_ref[...] += part.reshape(S, tb, H)

    @pl.when(k == nk - 1)
    def _finalize():
        # bias + ReLU on the fully-accumulated name2vec activations.
        nv = jnp.maximum(acc_ref[...] + bn_ref[...], 0.0)           # [S, tb, H]
        # fc contribution of the name features: VPU multiply + reductions
        # (no N=1 matmul, no lane-sparse intermediate stores).
        z = nv * wfn_ref[...]                                        # [S, tb, H]
        name_c = jnp.sum(jnp.sum(z, axis=0), axis=-1, keepdims=True)  # [tb, 1]
        # fc contribution of the title features.
        cls_c = jnp.sum(cls_ref[...] * wft_ref[...], axis=-1, keepdims=True)
        o_ref[...] = (cls_c + name_c + bfc_ref[...]).astype(o_ref.dtype)


# ---------------------------------------------------------------------------
# SimpleModel wrapper (BERT pooled output `cls_title` is a precomputed input).
# ---------------------------------------------------------------------------
@functools.partial(jax.jit, static_argnames=("tk", "tb", "use_bf16"))
def simple_model_forward(cls_title, name_ids, w_name, b_name, w_fc, b_fc,
                         *, tk=None, tb=None, use_bf16=False):
    """
    cls_title : [B, T]        BERT pooled [CLS] embedding (precomputed).
    name_ids  : [S=12, B, V]  stacked (director1..2, writer1..4, starring1..6).
    w_name    : [V, H], b_name: [1, H] or [H]
    w_fc      : [T + 12*H, 1], b_fc: [1, 1] or [1]
    returns   : [B, 1] float32
    """
    S, B, V = name_ids.shape
    T = cls_title.shape[1]
    H = w_name.shape[1]

    compute_dtype = jnp.bfloat16 if use_bf16 else jnp.float32
    itemsize = 2 if use_bf16 else 4

    # --- per-generation VMEM budget ----------------------------------------
    try:
        vmem_cap = int(getattr(pltpu.get_tpu_info(), "vmem_capacity_bytes",
                               128 * 1024 * 1024))
    except Exception:  # non-TPU tracing / older API: assume the common 128 MiB
        vmem_cap = 128 * 1024 * 1024
    small_vmem = vmem_cap <= 96 * 1024 * 1024            # v7x: 64 MiB per TC
    vmem_limit = (48 if small_vmem else 64) * 1024 * 1024
    vmem_limit = min(vmem_limit, int(vmem_cap * 0.75))

    # --- batch tiling (parallel axis; keep extent >= 2 for v7x megacore) ---
    if tb is None:
        tb = min(128, _round_up(max(1, (B + 1) // 2), 8))
    tb = min(_round_up(tb, 8), _round_up(B, 8))           # tb % 8 == 0 always
    Bp = _round_up(B, tb)
    nb = Bp // tb

    # --- K (vocab) tiling: big tiles, multiple of 128, fits the VMEM budget -
    if tk is None:
        tk = 2048 if (use_bf16 or not small_vmem) else 1024
    tk = _round_up(tk, 128)
    tk = min(tk, _round_up(V, 128))

    def _est_vmem(tk_, w_bytes_override=None):
        name_bytes = 2 * S * tb * tk_ * itemsize          # double-buffered
        w_bytes = (2 * tk_ * H * itemsize
                   if w_bytes_override is None else w_bytes_override)
        acc_bytes = S * tb * H * 4
        cls_bytes = 2 * tb * T * 4
        misc = (1 << 20)                                   # small operands etc.
        return name_bytes + w_bytes + acc_bytes + cls_bytes + misc

    while tk > 128 and _est_vmem(tk) > int(vmem_limit * 0.9):
        tk = _round_up(max(128, tk // 2), 128)

    Vp = _round_up(V, tk)
    nk = Vp // tk

    # --- padding (zero columns contribute 0 pre-bias; padded rows sliced) --
    if Bp != B:
        cls_title = jnp.pad(cls_title, ((0, Bp - B), (0, 0)))
        name_ids = jnp.pad(name_ids, ((0, 0), (0, Bp - B), (0, 0)))
    if Vp != V:
        name_ids = jnp.pad(name_ids, ((0, 0), (0, 0), (0, Vp - V)))
        w_name = jnp.pad(w_name, ((0, Vp - V), (0, 0)))

    # --- dominant HBM streams optionally in bf16; f32 accumulation in-kernel
    name_ids = name_ids.astype(compute_dtype)
    w_name = w_name.astype(compute_dtype)
    cls_title = cls_title.astype(jnp.float32)

    # --- split the fc weight along its input axis (PyTorch cat order) ------
    w_fc_t = w_fc[:T, 0].reshape(1, T).astype(jnp.float32)        # title rows
    w_fc_n = w_fc[T:, 0].reshape(S, 1, H).astype(jnp.float32)     # per-slot rows
    b_name2 = b_name.reshape(1, H).astype(jnp.float32)
    b_fc2 = b_fc.reshape(1, 1).astype(jnp.float32)

    # --- w_name placement: resident in VMEM when it would otherwise be
    #     re-streamed once per batch tile ------------------------------------
    w_full_bytes = 2 * Vp * H * itemsize                  # (double-buffered)
    w_resident = (nb > 1 and
                  _est_vmem(tk, w_bytes_override=w_full_bytes)
                  <= int(vmem_limit * 0.9))
    if w_resident:
        wn_spec = pl.BlockSpec((Vp, H), lambda i, k: (0, 0))
    else:
        wn_spec = pl.BlockSpec((tk, H), lambda i, k: (k, 0))

    out = pl.pallas_call(
        _fused_kernel,
        out_shape=jax.ShapeDtypeStruct((Bp, 1), jnp.float32),
        grid_spec=pltpu.PrefetchScalarGridSpec(
            num_scalar_prefetch=0,
            grid=(nb, nk),
            in_specs=[
                pl.BlockSpec((tb, T), lambda i, k: (i, 0)),          # cls_title
                pl.BlockSpec((S, tb, tk), lambda i, k: (0, i, k)),   # name_ids
                wn_spec,                                             # w_name
                pl.BlockSpec((1, H), lambda i, k: (0, 0)),           # b_name
                pl.BlockSpec((1, T), lambda i, k: (0, 0)),           # w_fc title
                pl.BlockSpec((S, 1, H), lambda i, k: (0, 0, 0)),     # w_fc names
                pl.BlockSpec((1, 1), lambda i, k: (0, 0)),           # b_fc
            ],
            out_specs=pl.BlockSpec((tb, 1), lambda i, k: (i, 0)),
            scratch_shapes=[pltpu.VMEM((S, tb, H), jnp.float32)],
        ),
        compiler_params=pltpu.CompilerParams(
            dimension_semantics=("parallel", "arbitrary"),
            vmem_limit_bytes=vmem_limit,
        ),
    )(cls_title, name_ids, w_name, b_name2, w_fc_t, w_fc_n, b_fc2)
    return out[:B]


# ---------------------------------------------------------------------------
# Plain-JAX reference matching the PyTorch forward (eval-mode dropout).
# ---------------------------------------------------------------------------
def _reference(cls_title, name_ids, w_name, b_name, w_fc, b_fc, cast=None):
    x, w = name_ids, w_name
    if cast is not None:
        x, w = x.astype(cast), w.astype(cast)
    vecs = jnp.maximum(
        jnp.einsum("sbv,vh->sbh", x, w, preferred_element_type=jnp.float32)
        + b_name.reshape(1, 1, -1), 0.0)
    B = cls_title.shape[0]
    feat = jnp.concatenate(
        [cls_title, jnp.transpose(vecs, (1, 0, 2)).reshape(B, -1)], axis=1)
    return feat @ w_fc + b_fc.reshape(1, 1)


if __name__ == "__main__":
    # Small shapes consistent with the module's forward.
    B = 24                # batch (config B); config A uses the first 2 rows
    T = 128               # input_size_title (downsized from 768)
    V = 256               # name_vocab_size  (downsized from 45718)
    H = 64                # name_vec_size
    S = 12                # 2 directors + 4 writers + 6 starring

    key = jax.random.PRNGKey(0)
    k_cls, k_names, k_wn, k_bn, k_wf, k_bf = jax.random.split(key, 6)

    # Deterministic parameters (torch.nn.Linear-style uniform init bounds).
    lim_n = 1.0 / (V ** 0.5)
    w_name = jax.random.uniform(k_wn, (V, H), jnp.float32, -lim_n, lim_n)
    b_name = jax.random.uniform(k_bn, (1, H), jnp.float32, -lim_n, lim_n)

    D = T + S * H
    lim_f = 1.0 / (D ** 0.5)
    w_fc = jax.random.uniform(k_wf, (D, 1), jnp.float32, -lim_f, lim_f)
    b_fc = jax.random.uniform(k_bf, (1, 1), jnp.float32, -lim_f, lim_f)

    # Deterministic example inputs.
    cls_title = jax.random.normal(k_cls, (B, T), jnp.float32)
    name_ids = jax.random.normal(k_names, (S, B, V), jnp.float32)

    # --- Config A: f32, single batch tile, K-tiled w_name stream -----------
    out_a = simple_model_forward(cls_title[:2], name_ids[:, :2], w_name,
                                 b_name, w_fc, b_fc, tk=128, tb=8,
                                 use_bf16=False)
    jax.block_until_ready(out_a)
    ref_a = _reference(cls_title[:2], name_ids[:, :2], w_name, b_name,
                       w_fc, b_fc)
    assert out_a.shape == (2, 1)
    assert jnp.allclose(out_a, ref_a, atol=1e-3, rtol=1e-3)

    # --- Config B: bf16 dominant streams, multiple batch tiles -> the
    #     w_name VMEM-resident path is exercised -----------------------------
    out_b = simple_model_forward(cls_title, name_ids, w_name, b_name,
                                 w_fc, b_fc, tk=128, tb=8, use_bf16=True)
    jax.block_until_ready(out_b)
    ref_b = _reference(cls_title, name_ids, w_name, b_name, w_fc, b_fc,
                       cast=jnp.bfloat16)
    assert out_b.shape == (B, 1)
    assert jnp.allclose(out_b, ref_b, atol=2e-3, rtol=2e-3)

    print("KERNEL_OK")
</pallas_src>

<mosaic_0001>
module attributes {stable_mosaic.version = 11 : i64} {
  func.func @_fused_kernel(%arg0: i32, %arg1: i32, %arg2: memref<8x128xf32, #tpu.memory_space<vmem>>, %arg3: memref<12x8x128xf32, #tpu.memory_space<vmem>>, %arg4: memref<128x64xf32, #tpu.memory_space<vmem>>, %arg5: memref<1x64xf32, #tpu.memory_space<vmem>>, %arg6: memref<1x128xf32, #tpu.memory_space<vmem>>, %arg7: memref<12x1x64xf32, #tpu.memory_space<vmem>>, %arg8: memref<1x1xf32, #tpu.memory_space<vmem>>, %arg9: memref<8x1xf32, #tpu.memory_space<vmem>>, %arg10: memref<12x8x64xf32, #tpu.memory_space<vmem>>) attributes {dimension_semantics = [#tpu.dimension_semantics<parallel>, #tpu.dimension_semantics<arbitrary>], iteration_bounds = array<i64: 1, 2>, scalar_prefetch = 0 : i64, scratch_operands = 1 : i64, tpu.core_type = #tpu.core_type<tc>, window_params = [{transform_indices = @transform_0, window_bounds = array<i64: 8, 128>}, {transform_indices = @transform_1, window_bounds = array<i64: 12, 8, 128>}, {transform_indices = @transform_2, window_bounds = array<i64: 128, 64>}, {pipeline_mode = #tpu.pipeline_mode<synchronous>, transform_indices = @transform_3, window_bounds = array<i64: 1, 64>}, {pipeline_mode = #tpu.pipeline_mode<synchronous>, transform_indices = @transform_4, window_bounds = array<i64: 1, 128>}, {pipeline_mode = #tpu.pipeline_mode<synchronous>, transform_indices = @transform_5, window_bounds = array<i64: 12, 1, 64>}, {pipeline_mode = #tpu.pipeline_mode<synchronous>, transform_indices = @transform_6, window_bounds = array<i64: 1, 1>}, {transform_indices = @transform_7, window_bounds = array<i64: 8, 1>}]} {
    %c0_i32 = arith.constant 0 : i32
    %0 = arith.cmpi eq, %arg1, %c0_i32 : i32
    %1 = arith.extui %0 : i1 to i32
    %c0_i32_0 = arith.constant 0 : i32
    %2 = arith.cmpi ne, %1, %c0_i32_0 : i32
    scf.if %2 {
      %cst_12 = arith.constant 0.000000e+00 : f32
      %14 = vector.broadcast %cst_12 : f32 to vector<12x8x64xf32>
      %c0_13 = arith.constant 0 : index
      %c0_14 = arith.constant 0 : index
      %c0_15 = arith.constant 0 : index
      %15 = vector.load %arg10[%c0_13, %c0_14, %c0_15] : memref<12x8x64xf32, #tpu.memory_space<vmem>>, vector<12x8x64xf32>
      tpu.vector_store %arg10[%c0_13, %c0_14, %c0_15], %14 {strides = array<i32>} : memref<12x8x64xf32, #tpu.memory_space<vmem>>, vector<12x8x64xf32>,
    } else {
    }
    %c0 = arith.constant 0 : index
    %c0_1 = arith.constant 0 : index
    %c0_2 = arith.constant 0 : index
    %3 = vector.load %arg3[%c0, %c0_1, %c0_2] : memref<12x8x128xf32, #tpu.memory_space<vmem>>, vector<12x8x128xf32>
    %4 = vector.shape_cast %3 : vector<12x8x128xf32> to vector<96x128xf32>
    %c0_3 = arith.constant 0 : index
    %c0_4 = arith.constant 0 : index
    %5 = vector.load %arg4[%c0_3, %c0_4] : memref<128x64xf32, #tpu.memory_space<vmem>>, vector<128x64xf32>
    %cst = arith.constant dense<0.000000e+00> : vector<96x64xf32>
    %6 = tpu.matmul %4, %5, %cst {dimension_numbers = #tpu.dot_dimension_numbers<[1], [0], [0], [1], [0, 0, 1, 1], [], []>} : vector<96x128xf32>, vector<128x64xf32>, vector<96x64xf32> -> vector<96x64xf32>
    %c0_5 = arith.constant 0 : index
    %c0_6 = arith.constant 0 : index
    %c0_7 = arith.constant 0 : index
    %7 = vector.load %arg10[%c0_5, %c0_6, %c0_7] : memref<12x8x64xf32, #tpu.memory_space<vmem>>, vector<12x8x64xf32>
    %8 = vector.shape_cast %6 : vector<96x64xf32> to vector<12x8x64xf32>
    %9 = arith.addf %7, %8 : vector<12x8x64xf32>
    %c0_8 = arith.constant 0 : index
    %c0_9 = arith.constant 0 : index
    %c0_10 = arith.constant 0 : index
    %10 = vector.load %arg10[%c0_8, %c0_9, %c0_10] : memref<12x8x64xf32, #tpu.memory_space<vmem>>, vector<12x8x64xf32>
    tpu.vector_store %arg10[%c0_8, %c0_9, %c0_10], %9 {strides = array<i32>} : memref<12x8x64xf32, #tpu.memory_space<vmem>>, vector<12x8x64xf32>,
    %c1_i32 = arith.constant 1 : i32
    %11 = arith.cmpi eq, %arg1, %c1_i32 : i32
    %12 = arith.extui %11 : i1 to i32
    %c0_i32_11 = arith.constant 0 : i32
    %13 = arith.cmpi ne, %12, %c0_i32_11 : i32
    scf.if %13 {
      %c0_12 = arith.constant 0 : index
      %c0_13 = arith.constant 0 : index
      %c0_14 = arith.constant 0 : index
      %14 = vector.load %arg10[%c0_12, %c0_13, %c0_14] : memref<12x8x64xf32, #tpu.memory_space<vmem>>, vector<12x8x64xf32>
      %c0_15 = arith.constant 0 : index
      %c0_16 = arith.constant 0 : index
      %15 = vector.load %arg5[%c0_15, %c0_16] : memref<1x64xf32, #tpu.memory_space<vmem>>, vector<1x64xf32>
      %16 = vector.shape_cast %15 : vector<1x64xf32> to vector<1x1x64xf32>
      %17 = vector.broadcast %16 : vector<1x1x64xf32> to vector<12x8x64xf32>
      %18 = arith.addf %14, %17 : vector<12x8x64xf32>
      %cst_17 = arith.constant 0.000000e+00 : f32
      %19 = vector.broadcast %cst_17 : f32 to vector<12x8x64xf32>
      %20 = arith.maximumf %18, %19 : vector<12x8x64xf32>
      %c0_18 = arith.constant 0 : index
      %c0_19 = arith.constant 0 : index
      %c0_20 = arith.constant 0 : index
      %21 = vector.load %arg7[%c0_18, %c0_19, %c0_20] : memref<12x1x64xf32, #tpu.memory_space<vmem>>, vector<12x1x64xf32>
      %22 = vector.broadcast %21 : vector<12x1x64xf32> to vector<12x8x64xf32>
      %23 = arith.mulf %20, %22 : vector<12x8x64xf32>
      %cst_21 = arith.constant dense<0.000000e+00> : vector<8x64xf32>
      %24 = vector.multi_reduction <add>, %23, %cst_21 [0] : vector<12x8x64xf32> to vector<8x64xf32>
      %cst_22 = arith.constant dense<0.000000e+00> : vector<8xf32>
      %25 = vector.multi_reduction <add>, %24, %cst_22 [1] : vector<8x64xf32> to vector<8xf32>
      %26 = vector.shape_cast %25 : vector<8xf32> to vector<8x1xf32>
      %c0_23 = arith.constant 0 : index
      %c0_24 = arith.constant 0 : index
      %27 = vector.load %arg2[%c0_23, %c0_24] : memref<8x128xf32, #tpu.memory_space<vmem>>, vector<8x128xf32>
      %c0_25 = arith.constant 0 : index
      %c0_26 = arith.constant 0 : index
      %28 = vector.load %arg6[%c0_25, %c0_26] : memref<1x128xf32, #tpu.memory_space<vmem>>, vector<1x128xf32>
      %29 = vector.broadcast %28 : vector<1x128xf32> to vector<8x128xf32>
      %30 = arith.mulf %27, %29 : vector<8x128xf32>
      %cst_27 = arith.constant dense<0.000000e+00> : vector<8xf32>
      %31 = vector.multi_reduction <add>, %30, %cst_27 [1] : vector<8x128xf32> to vector<8xf32>
      %32 = vector.shape_cast %31 : vector<8xf32> to vector<8x1xf32>
      %33 = arith.addf %32, %26 : vector<8x1xf32>
      %c0_28 = arith.constant 0 : index
      %c0_29 = arith.constant 0 : index
      %34 = vector.load %arg8[%c0_28, %c0_29] : memref<1x1xf32, #tpu.memory_space<vmem>>, vector<1x1xf32>
      %35 = vector.broadcast %34 : vector<1x1xf32> to vector<8x1xf32>
      %36 = arith.addf %33, %35 : vector<8x1xf32>
      %c0_30 = arith.constant 0 : index
      %c0_31 = arith.constant 0 : index
      %37 = vector.load %arg9[%c0_30, %c0_31] : memref<8x1xf32, #tpu.memory_space<vmem>>, vector<8x1xf32>
      tpu.vector_store %arg9[%c0_30, %c0_31], %36 {strides = array<i32>} : memref<8x1xf32, #tpu.memory_space<vmem>>, vector<8x1xf32>,
    } else {
    }
    return
  }
  func.func @transform_0(%arg0: i32, %arg1: i32) -> (i32, i32) {
    %c0_i32 = arith.constant 0 : i32
    %c0_i32_0 = arith.constant 0 : i32
    return %arg0, %c0_i32 : i32, i32
  }
  func.func @transform_1(%arg0: i32, %arg1: i32) -> (i32, i32, i32) {
    %c0_i32 = arith.constant 0 : i32
    %c0_i32_0 = arith.constant 0 : i32
    return %c0_i32, %arg0, %arg1 : i32, i32, i32
  }
  func.func @transform_2(%arg0: i32, %arg1: i32) -> (i32, i32) {
    %c0_i32 = arith.constant 0 : i32
    %c0_i32_0 = arith.constant 0 : i32
    return %arg1, %c0_i32 : i32, i32
  }
  func.func @transform_3(%arg0: i32, %arg1: i32) -> (i32, i32) {
    %c0_i32 = arith.constant 0 : i32
    %c0_i32_0 = arith.constant 0 : i32
    %c0_i32_1 = arith.constant 0 : i32
    return %c0_i32, %c0_i32_0 : i32, i32
  }
  func.func @transform_4(%arg0: i32, %arg1: i32) -> (i32, i32) {
    %c0_i32 = arith.constant 0 : i32
    %c0_i32_0 = arith.constant 0 : i32
    %c0_i32_1 = arith.constant 0 : i32
    return %c0_i32, %c0_i32_0 : i32, i32
  }
  func.func @transform_5(%arg0: i32, %arg1: i32) -> (i32, i32, i32) {
    %c0_i32 = arith.constant 0 : i32
    %c0_i32_0 = arith.constant 0 : i32
    %c0_i32_1 = arith.constant 0 : i32
    %c0_i32_2 = arith.constant 0 : i32
    return %c0_i32, %c0_i32_0, %c0_i32_1 : i32, i32, i32
  }
  func.func @transform_6(%arg0: i32, %arg1: i32) -> (i32, i32) {
    %c0_i32 = arith.constant 0 : i32
    %c0_i32_0 = arith.constant 0 : i32
    %c0_i32_1 = arith.constant 0 : i32
    return %c0_i32, %c0_i32_0 : i32, i32
  }
  func.func @transform_7(%arg0: i32, %arg1: i32) -> (i32, i32) {
    %c0_i32 = arith.constant 0 : i32
    %c0_i32_0 = arith.constant 0 : i32
    return %arg0, %c0_i32 : i32, i32
  }
}

</mosaic_0001>

<bundles_post_ra>
// kernel: squeeze.3
= control target key start
LH: loop header
LB: loop body
LE: loop exit
PB: predicated region body
PF: predicated region fallthrough
CT: control target
= control target key end

     0   :  { %vm4_vm0 = vcmask 523264   ;;  %s171_s0 = inlined_call_operand.vmem [shape: f32[768], index: 0, kind: input, shape index: {}]   ;;  %s172_s1 = inlined_call_operand.hbm [shape: f32[12,1,64], index: 1, kind: output, shape index: {}]  }
   0x1   :  { %v8_v0 = vld [vmem:[%s171_s0] sm:$0x3f]  }
   0x2   :  { %v3_v1 = vld [vmem:[%s171_s0] sm:$0x3f]   ;;  %s135_s0 = smov 64  }
   0x3   :  { %9 = vrot.lane.b32.xlu0 %v8_v0, %s135_s0  ;;  %5 = vst.msk [vmem:[#allocation2] ss:$16 sm:$0x3] %vm4_vm0, %v3_v1   ;;  %6 = vst.msk [vmem:[#allocation2] ss:$16 sm:$0xc] %vm4_vm0, %v3_v1  }
   0x4   :  { %7 = vst.msk [vmem:[#allocation2] ss:$16 sm:$0x30] %vm4_vm0, %v3_v1  }
   0x5   :  { %2 = vsyncpa [#allocation1], 0  ;;  %s136_s10 = smov [#allocation0]  }
   0x6   :  { %s93_s11 = sshll.u32 %s136_s10, 4  ;;  %s94_s11 = int_to_ptr.vmem [resolvable:$true] %s93_s11 }
   0x7   :  { %s111_s12 = scalar_lea.vmem %s94_s11, 192  ;;  %p116_p1 = scmp.lt.s32.totalorder %s94_s11, %s94_s11 }
   0x8   :  { %p112_p0 = scmp.ne.s32.totalorder %s94_s11, %s111_s12  ;;  %p117_p2 = scmp.lt.s32.totalorder %s111_s12, %s111_s12 }
   0xa   :  { %v21_v2 = vld [vmem:[#allocation2] sm:$0x1]  ;;  %v30_v3 = vld [vmem:[#allocation2 + $0x10] sm:$0x1]  ;;  %p118_p3 = por %p117_p2, %p116_p1 }
   0xb   :  { %v42_v4 = vld [vmem:[#allocation2 + $0x20] sm:$0x1]  ;;  %23 = vst [vmem:[#allocation0] sm:$0x1] %v21_v2  ;;  %34 = vst [vmem:[#allocation0 + $0x2] sm:$0x1] %v30_v3 }
   0xc   :  { %46 = vst [vmem:[#allocation0 + $0x4] sm:$0x1] %v42_v4  ;;  %v54_v5 = vld [vmem:[#allocation2 + $0x30] sm:$0x1]  ;;  %v66_v6 = vld [vmem:[#allocation2 + $0x40] sm:$0x1]  ;;  %p119_p4 = pnand %p118_p3, %p112_p0 }
   0xd   :  { %v78_v7 = vld [vmem:[#allocation2 + $0x50] sm:$0x1]  ;;  %58 = vst [vmem:[#allocation0 + $0x6] sm:$0x1] %v54_v5  ;;  %70 = vst [vmem:[#allocation0 + $0x8] sm:$0x1] %v66_v6 }
   0xe   :  { %82 = vst [vmem:[#allocation0 + $0xa] sm:$0x1] %v78_v7 }
  0x75   :  { %v10_v8 = vpop.permute.xlu0 %9  }
  0x76   :  { %13 = vst.msk [vmem:[#allocation2 + $0x8] ss:$16 sm:$0x3] %vm4_vm0, %v10_v8   ;;  %15 = vst.msk [vmem:[#allocation2 + $0x8] ss:$16 sm:$0xc] %vm4_vm0, %v10_v8  }
  0x77   :  { %17 = vst.msk [vmem:[#allocation2 + $0x8] ss:$16 sm:$0x30] %vm4_vm0, %v10_v8  }
  0x7d   :  { %v25_v9 = vld [vmem:[#allocation2 + $0x8] sm:$0x1]  ;;  %v36_v10 = vld [vmem:[#allocation2 + $0x18] sm:$0x1] }
  0x7e   :  { %v48_v11 = vld [vmem:[#allocation2 + $0x28] sm:$0x1]  ;;  %28 = vst [vmem:[#allocation0 + $0x1] sm:$0x1] %v25_v9  ;;  %40 = vst [vmem:[#allocation0 + $0x3] sm:$0x1] %v36_v10 }
  0x7f   :  { %52 = vst [vmem:[#allocation0 + $0x5] sm:$0x1] %v48_v11  ;;  %v60_v12 = vld [vmem:[#allocation2 + $0x38] sm:$0x1]  ;;  %v72_v13 = vld [vmem:[#allocation2 + $0x48] sm:$0x1] }
  0x80   :  { %v84_v14 = vld [vmem:[#allocation2 + $0x58] sm:$0x1]  ;;  %64 = vst [vmem:[#allocation0 + $0x7] sm:$0x1] %v60_v12  ;;  %76 = vst [vmem:[#allocation0 + $0x9] sm:$0x1] %v72_v13 }
  0x81   :  { %88 = vst [vmem:[#allocation0 + $0xb] sm:$0x1] %v84_v14 }
  0x82   :  { %122 = shalt.err (!%p119_p4)
}
  0x83   :  { %s123_s15 = scalar_lea.hbm %s172_s1, 192 }
  0x84   :  { %p124_p5 = scmp.ne.s32.totalorder %s172_s1, %s123_s15  ;;  %p127_p6 = scmp.lt.u32.totalorder %s123_s15, %s172_s1 }
  0x86   :  { %p129_p7 = pnand %p127_p6, %p124_p5 }
  0x88   :  { %132 = shalt.err (!%p129_p7)
}
  0x89   :  { %96 = dma.vmem_to_hbm [thread:$0]  %s94_s11, 192, %s172_s1, [#allocation1]  }
  0x8a   :  { %133 = dma.done.wait [#allocation1], 192  }
  0x8b   :  { %134 = vsyncadd [#allocation1], 4294967104 }
  0x8c   :  { %98 = vsyncpa [#allocation1], 1 }

// kernel: simple_model_forward.1
= control target key start
LH: loop header
LB: loop body
LE: loop exit
PB: predicated region body
PF: predicated region fallthrough
CT: control target
= control target key end

     0   :  { %s1896_s0 = inlined_call_operand.hbm [shape: f32[8,128], index: 0, kind: input, shape index: {}]   ;;  %s1897_s1 = inlined_call_operand.hbm [shape: f32[12,8,256], index: 1, kind: input, shape index: {}]   ;;  %s1898_s2 = inlined_call_operand.hbm [shape: f32[256,64], index: 2, kind: input, shape index: {}]   ;;  %s1899_s3 = inlined_call_operand.hbm [shape: f32[1,64], index: 3, kind: input, shape index: {}]   ;;  %s1900_s4 = inlined_call_operand.hbm [shape: f32[1,128], index: 4, kind: input, shape index: {}]   ;;  %s1901_s5 = inlined_call_operand.hbm [shape: f32[12,1,64], index: 5, kind: input, shape index: {}]   ;;  %s1902_s6 = inlined_call_operand.<no memory space> [shape: f32[1,1], index: 6, kind: input, shape index: {}]   ;;  %s1903_s7 = inlined_call_operand.hbm [shape: f32[8,1], index: 7, kind: output, shape index: {}]  }
   0x1   :  { %1915 = sst [smem:[#allocation23_spill]] %s1897_s1  ;;  %v12_v0 = vstv %s1902_s6 }
   0x2   :  { %1916 = sst [smem:[#allocation24_spill]] %s1899_s3  ;;  %13 = vst [vmem:[#allocation3] sm:$0x1] %v12_v0 }
   0x3   :  { %14 = vsyncpa [#allocation5], 0 }
   0x4   :  { %15 = vsyncpa [#allocation8], 0 }
   0x5   :  { %17 = vsyncpa [#allocation8 + $0x1], 0 }
   0x6   :  { %18 = vsyncpa [#allocation11], 0 }
   0x7   :  { %19 = vsyncpa [#allocation14], 0 }
   0x8   :  { %20 = vsyncpa [#allocation6], 0  ;;  %s1541_s26 = smov 0   ;;  %s1543_s27 = smov 0  }
   0x9   :  { %s1545_s28 = smov 0   ;;  %s1547_s29 = smov 0  }
   0xa   :  { %s1549_s30 = smov 0   ;;  %s1551_s8 = smov 0  }
   0xb LB: > { %s1570_s6 = sadd.s32 4294967295, %s1483_s8   ;;  %p86_p0 = scmp.ne.s32.totalorder %s1467_s27, %s1463_s26  ;;  %s1483_s8 = sphi %s1551_s8, %s26_s8   ;;  %s1479_s30 = sphi %s1549_s30, %s1948_s30   ;;  %s1475_s29 = sphi %s1547_s29, %s1947_s29   ;;  %s1471_s28 = sphi %s1545_s28, %s1946_s28   ;;  %s1467_s27 = sphi %s1543_s27, %s1945_s27   ;;  %s1463_s26 = sphi %s1541_s26, %s1944_s26  }
   0xc   : > { %p1904_p1 = scmp.eq.s32.totalorder %s1570_s6, 0  ;;  %p939_p2 = scmp.ge.s32.totalorder %s1483_s8, 1 }
   0xd   : > { %p233_p3 = scmp.lt.s32.totalorder %s1483_s8, 3  ;;  %s1485_s11 = smov [#allocation10]  }
   0xe   : > { %p1578_p4 = por %p1904_p1, %p86_p0  ;;  %s259_s12 = sshll.u32 %s1485_s11, 4  ;;  %s260_s12 = int_to_ptr.vmem [resolvable:$true] %s259_s12 }
   0xf   : > { %p1582_p5 = pnand %p939_p2, %p233_p3  ;;  %s35_s14 = sadd.s32 1, %s1479_s30 }
  0x10   : > { %s1917_s9 = scalar_select %p1578_p4, 1, 0 }
  0x11   : > { %s1918_s10 = scalar_select %p1582_p5, 1, 0 }
  0x12   : > { %p1129_p6 = pneg %p1582_p5  ;;  %s73_s15 = sadd.s32 1, %s1471_s28 }
  0x13   : > { %p1596_p8 = scmp.ge.s32.totalorder %s35_s14, 2  ;;  %s1921_s3 = sld [smem:[#allocation24_spill]] }
  0x14   : > { %p1590_p7 = pnand %p1129_p6, %p1904_p1 }
  0x15   : > { %s1920_s16 = scalar_select %p1596_p8, 1, 0 }
  0x16   : > { %s1919_s13 = scalar_select %p1590_p7, 1, 0 }
  0x17   : > { %p1608_p10 = pneg %p1590_p7 }
  0x19   : > { %s1219_s19 = scalar_lea.hbm %s1921_s3, 16 }
  0x1a   : > { %p1220_p9 = scmp.ne.s32.totalorder %s1921_s3, %s1219_s19  ;;  %p1226_p13 = scmp.lt.u32.totalorder %s1219_s19, %s1921_s3 }
  0x1c   : > { %p1222_p11 = pnand %p1608_p10, %p1220_p9 }
  0x1e   : > { %p1223_p12 = pneg %p1222_p11 }
  0x20   : > { %p1228_p0 = pnand %p1226_p13, %p1223_p12 }
  0x22   : > { %1231 = shalt.err (!%p1228_p0)
}
  0x23   : > { %s1232_s25 = scalar_lea.vmem %s260_s12, 16  ;;  %s1239_s26 = scalar_lea.vmem %s260_s12, 32 }
  0x24   : > { %p1233_p2 = scmp.ne.s32.totalorder %s260_s12, %s1232_s25  ;;  %p1240_p1 = scmp.lt.s32.totalorder %s260_s12, %s260_s12 }
  0x25   : > { %p1241_p4 = scmp.lt.s32.totalorder %s1239_s26, %s1232_s25 }
  0x26   : > { %p1235_p3 = pnand %p1233_p2, %p1608_p10 }
  0x27   : > { %p1242_p5 = por %p1241_p4, %p1240_p1 }
  0x28   : > { %p1236_p6 = pneg %p1235_p3 }
  0x2a   : > { %p1243_p8 = pnand %p1242_p5, %p1236_p6 }
  0x2c   : > { %1246 = shalt.err (!%p1243_p8)
}
  0x2d   : > { %1135 = dma.hbm_to_vmem [thread:$0]  (!%p1590_p7), %s1921_s3, 16, %s260_s12, [#allocation11]  }
  0x2e   : > { %p1923_p1 = scmp.ne.s32.totalorder %s1920_s16, 0  ;;  %p80_p4 = scmp.ne.s32.totalorder %s1471_s28, %s1467_s27 }
  0x2f   : > { %p81_p5 = scmp.eq.s32.totalorder %s1483_s8, 0  ;;  %p1153_p8 = scmp.lt.s32.totalorder %s1483_s8, 2 }
  0x30   : > { %s1950_s14 = smov (%p1923_p1, %s35_s14), 0  ;;  %s297_s19 = sand.u32 1, %s1483_s8  }
  0x31   : > { %1924 = sst [smem:[#allocation21_spill]] %s1950_s14  ;;  %s69_s18 = ssub.s32 %s1479_s30, %s1950_s14 }
  0x32   : > { %p71_p9 = scmp.eq.s32.totalorder %s69_s18, 0  ;;  %p82_p11 = por %p81_p5, %p80_p4 }
  0x33   : > { %s1907_s20 = sand.u32 1, %s1471_s28   ;;  %s945_s24 = sshll.u32 %s1479_s30, 7 }
  0x34   : > { %s1639_s21 = scalar_select %p71_p9, %s1471_s28, %s73_s15  }
  0x35   : > { %s1103_s23 = smul.u32 96, %s1907_s20  ;;  %p1644_p12 = pnand %p1153_p8, %p82_p11 }
  0x36   : > { %1925 = sst [smem:[#allocation22_spill]] %s1639_s21  ;;  %s1927_s1 = sld [smem:[#allocation23_spill]] }
  0x37   : > { %s1926_s12 = scalar_select %p1644_p12, 1, 0 }
  0x38   : > { %s301_s15 = scalar_lea.vmem [#allocation7], %s1103_s23  ;;  %s1655_s17 = scalar_lea.sflag [#allocation8], %s297_s19 }
  0x39   : > { %s309_s11 = sshll.u32 %s301_s15, 4  ;;  %p1911_p0 = pneg %p1644_p12  ;;  %s1653_s11 = int_to_ptr.vmem [resolvable:$true] %s309_s11 }
  0x3c   : > { %s1651_s26 = scalar_lea.hbm %s1927_s1, %s945_s24  ;;  %s1252_s25 = scalar_lea.hbm %s1927_s1, 3072 }
  0x3d   : > { %s1247_s18 = scalar_lea.hbm %s1651_s26, 1536  ;;  %p1253_p6 = scmp.lt.u32.totalorder %s1651_s26, %s1927_s1 }
  0x3e   : > { %p1248_p13 = scmp.ne.s32.totalorder %s1651_s26, %s1247_s18  ;;  %p1254_p1 = scmp.lt.u32.totalorder %s1252_s25, %s1247_s18 }
  0x3f   : > { %p1256_p5 = scmp.lt.u32.totalorder %s1247_s18, %s1651_s26 }
  0x40   : > { %p1250_p2 = pnand %p1911_p0, %p1248_p13  ;;  %p1255_p4 = por %p1254_p1, %p1253_p6 }
  0x42   : > { %p1251_p3 = pneg %p1250_p2  ;;  %p1257_p8 = por %p1256_p5, %p1255_p4 }
  0x44   : > { %p1258_p9 = pnand %p1257_p8, %p1251_p3 }
  0x46   : > { %1261 = shalt.err (!%p1258_p9)
}
  0x47   : > { %s1262_s19 = scalar_lea.vmem %s1653_s11, 1536  ;;  %s1486_s23 = smov [#allocation7]  }
  0x48   : > { %p1263_p11 = scmp.ne.s32.totalorder %s1653_s11, %s1262_s19  ;;  %s1267_s15 = sshll.u32 %s1486_s23, 4  ;;  %s1268_s15 = int_to_ptr.vmem [resolvable:$false] %s1267_s15 }
  0x49   : > { %s1269_s3 = scalar_lea.vmem %s1268_s15, 3072  ;;  %p1270_p7 = scmp.lt.s32.totalorder %s1653_s11, %s1268_s15 }
  0x4a   : > { %p1265_p13 = pnand %p1263_p11, %p1911_p0  ;;  %p1271_p6 = scmp.lt.s32.totalorder %s1269_s3, %s1262_s19 }
  0x4c   : > { %p1266_p2 = pneg %p1265_p13  ;;  %p1272_p1 = por %p1271_p6, %p1270_p7 }
  0x4e   : > { %p1273_p4 = pnand %p1272_p1, %p1266_p2 }
  0x50   : > { %1276 = shalt.err (!%p1273_p4)
}
  0x51   : > { %s1487_s20 = smov 256   ;;  %s1912_s18 = smov 128  }
  0x52   : > { %s1489_s24 = smov 8   ;;  %s1490_s16 = smov [#allocation4]  }
  0x53   : > { %1145 = dma.hbm_to_vmem [thread:$0]  (!%p1644_p12), %s1651_s26, 1536, %s1653_s11, %s1655_s17, %s1487_s20, %s1912_s18, %s1489_s24  }
  0x54   : > { %s248_s25 = sshll.u32 %s1490_s16, 4  ;;  %s1277_s15 = scalar_lea.hbm %s1896_s0, 128  ;;  %s249_s25 = int_to_ptr.vmem [resolvable:$true] %s248_s25 }
  0x55   : > { %p1278_p7 = scmp.ne.s32.totalorder %s1896_s0, %s1277_s15  ;;  %p1284_p8 = scmp.lt.u32.totalorder %s1277_s15, %s1896_s0 }
  0x57   : > { %p1280_p3 = pnand %p1278_p7, %p1608_p10 }
  0x59   : > { %p1281_p5 = pneg %p1280_p3 }
  0x5b   : > { %p1286_p9 = pnand %p1284_p8, %p1281_p5 }
  0x5d   : > { %1289 = shalt.err (!%p1286_p9)
}
  0x5e   : > { %s1290_s26 = scalar_lea.vmem %s249_s25, 128  ;;  %p1298_p6 = scmp.lt.s32.totalorder %s249_s25, %s249_s25 }
  0x5f   : > { %p1291_p11 = scmp.ne.s32.totalorder %s249_s25, %s1290_s26  ;;  %p1299_p1 = scmp.lt.s32.totalorder %s1290_s26, %s1290_s26 }
  0x61   : > { %p1293_p13 = pnand %p1291_p11, %p1608_p10  ;;  %p1300_p4 = por %p1299_p1, %p1298_p6 }
  0x63   : > { %p1294_p2 = pneg %p1293_p13 }
  0x65   : > { %p1301_p0 = pnand %p1300_p4, %p1294_p2 }
  0x67   : > { %1304 = shalt.err (!%p1301_p0)
}
  0x68   : > { %p1928_p7 = scmp.ne.s32.totalorder %s1919_s13, 0  ;;  %s1491_s14 = smov [#allocation12]  }
  0x69   : > { %s270_s21 = sshll.u32 %s1491_s14, 4  ;;  %s1492_s20 = smov [#allocation13]   ;;  %s271_s21 = int_to_ptr.vmem [resolvable:$true] %s270_s21 }
  0x6a   : > { %1132 = dma.hbm_to_vmem [thread:$0]  (!%p1928_p7), %s1896_s0, 128, %s249_s25, [#allocation5]  }
  0x6b   : > { %s280_s16 = sshll.u32 %s1492_s20, 4  ;;  %s1305_s15 = scalar_lea.hbm %s1900_s4, 16  ;;  %s281_s16 = int_to_ptr.vmem [resolvable:$true] %s280_s16 }
  0x6c   : > { %p1306_p0 = scmp.ne.s32.totalorder %s1900_s4, %s1305_s15  ;;  %p1312_p8 = scmp.lt.u32.totalorder %s1305_s15, %s1900_s4 }
  0x6e   : > { %p1308_p3 = pnand %p1306_p0, %p1608_p10 }
  0x70   : > { %p1309_p5 = pneg %p1308_p3 }
  0x72   : > { %p1314_p9 = pnand %p1312_p8, %p1309_p5 }
  0x74   : > { %1317 = shalt.err (!%p1314_p9)
}
  0x75   : > { %s1318_s25 = scalar_lea.vmem %s271_s21, 16  ;;  %s1325_s11 = scalar_lea.vmem %s271_s21, 32 }
  0x76   : > { %p1319_p11 = scmp.ne.s32.totalorder %s271_s21, %s1318_s25  ;;  %p1326_p6 = scmp.lt.s32.totalorder %s271_s21, %s271_s21 }
  0x77   : > { %p1327_p1 = scmp.lt.s32.totalorder %s1325_s11, %s1318_s25 }
  0x78   : > { %p1321_p13 = pnand %p1319_p11, %p1608_p10 }
  0x79   : > { %p1328_p4 = por %p1327_p1, %p1326_p6 }
  0x7a   : > { %p1322_p2 = pneg %p1321_p13 }
  0x7c   : > { %p1329_p12 = pnand %p1328_p4, %p1322_p2 }
  0x7e   : > { %1332 = shalt.err (!%p1329_p12)
}
  0x7f   : > { %1138 = dma.hbm_to_vmem [thread:$0]  (!%p1928_p7), %s1900_s4, 16, %s271_s21, [#allocation11]  }
  0x80   : > { %s1929_s18 = sand.u32 1, %s1471_s28   ;;  %s1333_s3 = scalar_lea.hbm %s1901_s5, 192 }
  0x81   : > { %s946_s23 = sshll.u32 %s1929_s18, 7  ;;  %p1334_p0 = scmp.ne.s32.totalorder %s1901_s5, %s1333_s3 }
  0x82   : > { %p1340_p5 = scmp.lt.u32.totalorder %s1333_s3, %s1901_s5 }
  0x83   : > { %p1336_p12 = pnand %p1334_p0, %p1608_p10 }
  0x85   : > { %p1337_p3 = pneg %p1336_p12 }
  0x87   : > { %p1342_p8 = pnand %p1340_p5, %p1337_p3 }
  0x89   : > { %1345 = shalt.err (!%p1342_p8)
}
  0x8a   : > { %s1346_s21 = scalar_lea.vmem %s281_s16, 192  ;;  %p1354_p2 = scmp.lt.s32.totalorder %s281_s16, %s281_s16 }
  0x8b   : > { %p1347_p9 = scmp.ne.s32.totalorder %s281_s16, %s1346_s21  ;;  %p1355_p6 = scmp.lt.s32.totalorder %s1346_s21, %s1346_s21 }
  0x8d   : > { %p1349_p11 = pnand %p1347_p9, %p1608_p10  ;;  %p1356_p1 = por %p1355_p6, %p1354_p2 }
  0x8f   : > { %p1350_p13 = pneg %p1349_p11 }
  0x91   : > { %p1357_p4 = pnand %p1356_p1, %p1350_p13 }
  0x93   : > { %1360 = shalt.err (!%p1357_p4)
}
  0x94   : > { %s1493_s14 = smov 16   ;;  %s1494_s20 = smov 1  }
  0x95   : > { %1141 = dma.hbm_to_vmem [thread:$0]  (!%p1928_p7), %s1901_s5, 192, %s281_s16, [#allocation14], %s1493_s14, %s1493_s14, %s1494_s20  }
  0x96   : > { %s976_s15 = sshll.u32 %s1479_s30, 11  ;;  %s323_s1 = scalar_lea.vmem [#allocation9], %s946_s23 }
  0x97   : > { %s1745_s26 = scalar_lea.hbm %s1898_s2, %s976_s15  ;;  %s330_s25 = sshll.u32 %s323_s1, 4  ;;  %s1747_s25 = int_to_ptr.vmem [resolvable:$true] %s330_s25 }
  0x98   : > { %s1361_s11 = scalar_lea.hbm %s1745_s26, 2048  ;;  %p1930_p0 = scmp.ne.s32.totalorder %s1926_s12, 0 }
  0x99   : > { %p1362_p10 = scmp.ne.s32.totalorder %s1745_s26, %s1361_s11  ;;  %s1366_s21 = scalar_lea.hbm %s1898_s2, 4096 }
  0x9a   : > { %p1931_p12 = pneg %p1930_p0  ;;  %p1367_p5 = scmp.lt.u32.totalorder %s1745_s26, %s1898_s2 }
  0x9b   : > { %p1368_p8 = scmp.lt.u32.totalorder %s1366_s21, %s1361_s11  ;;  %p1370_p11 = scmp.lt.u32.totalorder %s1361_s11, %s1745_s26 }
  0x9c   : > { %p1364_p3 = pnand %p1362_p10, %p1931_p12 }
  0x9d   : > { %p1369_p9 = por %p1368_p8, %p1367_p5 }
  0x9e   : > { %p1365_p7 = pneg %p1364_p3 }
  0x9f   : > { %p1371_p13 = por %p1370_p11, %p1369_p9 }
  0xa1   : > { %p1372_p2 = pnand %p1371_p13, %p1365_p7 }
  0xa3   : > { %1375 = shalt.err (!%p1372_p2)
}
  0xa4   : > { %s1376_s23 = scalar_lea.vmem %s1747_s25, 2048  ;;  %p1932_p1 = pmov %p1931_p12 }
  0xa5   : > { %p1377_p6 = scmp.ne.s32.totalorder %s1747_s25, %s1376_s23  ;;  %s1495_s18 = smov [#allocation9]  }
  0xa6   : > { %s1381_s19 = sshll.u32 %s1495_s18, 4  ;;  %s1382_s19 = int_to_ptr.vmem [resolvable:$false] %s1381_s19 }
  0xa7   : > { %p1379_p4 = pnand %p1377_p6, %p1932_p1  ;;  %s1383_s15 = scalar_lea.vmem %s1382_s19, 4096 }
  0xa8   : > { %p1384_p12 = scmp.lt.s32.totalorder %s1747_s25, %s1382_s19  ;;  %p1385_p3 = scmp.lt.s32.totalorder %s1383_s15, %s1376_s23 }
  0xa9   : > { %p1380_p10 = pneg %p1379_p4 }
  0xaa   : > { %p1386_p5 = por %p1385_p3, %p1384_p12 }
  0xac   : > { %p1387_p8 = pnand %p1386_p5, %p1380_p10 }
  0xae   : > { %1390 = shalt.err (!%p1387_p8)
}
  0xaf   : > { %s1933_s3 = smov 128   ;;  %p1934_p7 = scmp.ne.s32.totalorder %s1918_s10, 0 }
  0xb0   : > { %1148 = dma.hbm_to_vmem [thread:$0]  (!%p1930_p0), %s1745_s26, 2048, %s1747_s25, %s1655_s17, %s1933_s3, %s1933_s3, %s1489_s24  }
  0xb1   : > { %342 = sbr.rel (%p1934_p7) target bundleno = 671 (0x29f), region = 48  ;;  %p1935_p9 = scmp.eq.s32.totalorder (!%p1934_p7), %s1570_s6, 0 }
  0xb8   : > { %1442 = dma.done.wait (%p1935_p9), [#allocation5], 128   ;;  %p1936_p11 = pmov %p1935_p9 }
  0xb9   : > { %s348_s12 = sand.u32 1, %s1570_s6   ;;  %s350_s22 = sand.u32 1, %s1467_s27  }
  0xba   : > { %1444 = vsyncadd (%p1936_p11), [#allocation5], 4294967168  ;;  %s1104_s1 = smul.u32 96, %s350_s22  ;;  %s349_s11 = scalar_lea.sflag [#allocation8], %s348_s12 }
  0xbb   : > { %p1937_p13 = scmp.ne.s32.totalorder %s1917_s9, 0 }
  0xbc   : > { %s1784_s13 = scalar_lea.vmem [#allocation7], %s1104_s1 }
  0xbd   : > { %1446 = dma.done.wait (%p1937_p13), %s349_s11, 3584  }
  0xbe   : > { %1448 = vsyncadd (%p1937_p13), %s349_s11, 4294963712  ;;  %s951_s10 = sshll.u32 %s350_s22, 7  ;;  %p1938_p0 = pmov %p1935_p9 }
  0xbf   : > { %s1790_s17 = scalar_lea.vmem [#allocation9], %s951_s10 }
  0xc0   : > { %1450 = dma.done.wait (%p1938_p0), [#allocation11], 32   ;;  %p1939_p2 = pmov %p1938_p0 }
  0xc1   : > { %p1940_p6 = pmov %p1938_p0 }
  0xc2   : > { %1452 = vsyncadd (%p1939_p2), [#allocation11], 4294967264 }
  0xc3   : > { %1454 = dma.done.wait (%p1940_p6), [#allocation14], 192   ;;  %p1941_p1 = pmov %p1938_p0 }
  0xc4   : > { %p955_p4 = scmp.ne.s32.totalorder %s1475_s29, 0 }
  0xc5   : > { %1456 = vsyncadd (%p1941_p1), [#allocation14], 4294967104  ;;  %vm409_vm0 = vcmask (!%p955_p4), 523264   ;;  %v1496_v1 = vmov (!%p955_p4), 0.0  }
  0xc6   : > { %408 = sbr.rel (%p955_p4) target bundleno = 205 (0xcd), region = 76  ;;  %410 = vst.msk [vmem:[#allocation2] sm:$0xff] (!%p955_p4), %vm409_vm0, %v1496_v1  ;;  %411 = vst.msk [vmem:[#allocation2 + $0x8] sm:$0xff] (!%p955_p4), %vm409_vm0, %v1496_v1 }
  0xc7   : > { %412 = vst.msk [vmem:[#allocation2 + $0x10] sm:$0xff] (!%p955_p4), %vm409_vm0, %v1496_v1  ;;  %413 = vst.msk [vmem:[#allocation2 + $0x18] sm:$0xff] (!%p955_p4), %vm409_vm0, %v1496_v1 }
  0xc8   : > { %414 = vst.msk [vmem:[#allocation2 + $0x20] sm:$0xff] (!%p955_p4), %vm409_vm0, %v1496_v1  ;;  %415 = vst.msk [vmem:[#allocation2 + $0x28] sm:$0xff] (!%p955_p4), %vm409_vm0, %v1496_v1 }
  0xc9   : > { %416 = vst.msk [vmem:[#allocation2 + $0x30] sm:$0xff] (!%p955_p4), %vm409_vm0, %v1496_v1  ;;  %417 = vst.msk [vmem:[#allocation2 + $0x38] sm:$0xff] (!%p955_p4), %vm409_vm0, %v1496_v1 }
  0xca   : > { %418 = vst.msk [vmem:[#allocation2 + $0x40] sm:$0xff] (!%p955_p4), %vm409_vm0, %v1496_v1  ;;  %419 = vst.msk [vmem:[#allocation2 + $0x48] sm:$0xff] (!%p955_p4), %vm409_vm0, %v1496_v1 }
  0xcb   : > { %420 = vst.msk [vmem:[#allocation2 + $0x50] sm:$0xff] (!%p955_p4), %vm409_vm0, %v1496_v1  ;;  %421 = vst.msk [vmem:[#allocation2 + $0x58] sm:$0xff] (!%p955_p4), %vm409_vm0, %v1496_v1 }
  0xcd PF: > { %v434_v2 = vld [vmem:[%s1790_s17] sm:$0xff]  ;;  %v435_v3 = vld [vmem:[%s1790_s17 + $0x8] sm:$0xff]  ;;  %v436_v4 = vld [vmem:[%s1790_s17 + $0x10] sm:$0xff]  ;;  %vm599_vm1 = vcmask 523264   ;;  %p956_p10 = scmp.ne.s32.totalorder %s1475_s29, 1 }
  0xce   : > { %v1055_v5 = vpack.c.bf16 %v435_v3, %v434_v2  ;;  %v437_v6 = vld [vmem:[%s1790_s17 + $0x18] sm:$0xff]  ;;  %v438_v8 = vld [vmem:[%s1790_s17 + $0x20] sm:$0xff]  ;;  %v439_v9 = vld [vmem:[%s1790_s17 + $0x28] sm:$0xff]  ;;  %vm801_vm2 = vcmask (!%p956_p10), 7168  }
  0xcf   : > { %v1059_v7 = vpack.c.bf16 %v437_v6, %v436_v4  ;;  %v1063_v10 = vpack.c.bf16 %v439_v9, %v438_v8  ;;  %v422_v11 = vld [vmem:[%s1784_s13] sm:$0xff]  ;;  %v428_v12 = vld [vmem:[%s1784_s13 + $0x30] sm:$0xff]  ;;  %v441_v14 = vld [vmem:[%s1790_s17 + $0x38] sm:$0xff] }
  0xd0   : > { %1056 = vmatprep.subr.bf16.mxu0 %v1055_v5  ;;  %1087 = vmatprep.subr.bf16.mxu1 %v1055_v5  ;;  %v440_v13 = vld [vmem:[%s1790_s17 + $0x30] sm:$0xff]  ;;  %v442_v16 = vld [vmem:[%s1790_s17 + $0x40] sm:$0xff]  ;;  %v443_v17 = vld [vmem:[%s1790_s17 + $0x48] sm:$0xff] }
  0xd1   : > { %1058 = vmatpush3.bf16.msra.mxu0 %v1055_v5  ;;  %1095 = vmatpush3.bf16.msra.mxu1 %v1055_v5  ;;  %v1067_v15 = vpack.c.bf16 %v441_v14, %v440_v13  ;;  %v1071_v18 = vpack.c.bf16 %v443_v17, %v442_v16  ;;  %v444_v19 = vld [vmem:[%s1790_s17 + $0x50] sm:$0xff]  ;;  %v445_v20 = vld [vmem:[%s1790_s17 + $0x58] sm:$0xff]  ;;  %v446_v22 = vld [vmem:[%s1790_s17 + $0x60] sm:$0xff] }
  0xd2   : > { %1060 = vmatprep.subr.bf16.mxu0 %v1059_v7  ;;  %1088 = vmatprep.subr.bf16.mxu1 %v1059_v7  ;;  %v1075_v21 = vpack.c.bf16 %v445_v20, %v444_v19  ;;  %v447_v23 = vld [vmem:[%s1790_s17 + $0x68] sm:$0xff]  ;;  %v448_v25 = vld [vmem:[%s1790_s17 + $0x70] sm:$0xff]  ;;  %v449_v26 = vld [vmem:[%s1790_s17 + $0x78] sm:$0xff] }
  0xd3   : > { %1037 = vmatprep.mubr.f32.mxu0 %v422_v11  ;;  %1046 = vmatprep.mubr.f32.mxu1 %v428_v12  ;;  %v1079_v24 = vpack.c.bf16 %v447_v23, %v446_v22  ;;  %v1083_v27 = vpack.c.bf16 %v449_v26, %v448_v25  ;;  %v423_v28 = vld [vmem:[%s1784_s13 + $0x8] sm:$0xff]  ;;  %v429_v29 = vld [vmem:[%s1784_s13 + $0x38] sm:$0xff]  ;;  %v424_v30 = vld [vmem:[%s1784_s13 + $0x10] sm:$0xff] }
  0xd4   : > { %v430_v31 = vld [vmem:[%s1784_s13 + $0x40] sm:$0xff]  ;;  %v425_v32 = vld [vmem:[%s1784_s13 + $0x18] sm:$0xff]  ;;  %v431_v33 = vld [vmem:[%s1784_s13 + $0x48] sm:$0xff] }
  0xd5   : > { %1062 = vmatpush3.bf16.msra.mxu0 %v1059_v7  ;;  %1096 = vmatpush3.bf16.msra.mxu1 %v1059_v7  ;;  %v426_v34 = vld [vmem:[%s1784_s13 + $0x20] sm:$0xff]  ;;  %v432_v35 = vld [vmem:[%s1784_s13 + $0x50] sm:$0xff]  ;;  %v427_v36 = vld [vmem:[%s1784_s13 + $0x28] sm:$0xff] }
  0xd6   : > { %1064 = vmatprep.subr.bf16.mxu0 %v1063_v10  ;;  %1089 = vmatprep.subr.bf16.mxu1 %v1063_v10  ;;  %v433_v37 = vld [vmem:[%s1784_s13 + $0x58] sm:$0xff]  ;;  %v582_v39 = vld [vmem:[#allocation2 + $0x38] sm:$0xff]  ;;  %v581_v41 = vld [vmem:[#allocation2 + $0x30] sm:$0xff] }
  0xd7   : > { %v576_v38 = vld [vmem:[#allocation2 + $0x8] sm:$0xff]  ;;  %v575_v40 = vld [vmem:[#allocation2] sm:$0xff]  ;;  %v578_v50 = vld [vmem:[#allocation2 + $0x18] sm:$0xff] }
  0xd8   : > { %v584_v51 = vld [vmem:[#allocation2 + $0x48] sm:$0xff]  ;;  %v577_v52 = vld [vmem:[#allocation2 + $0x10] sm:$0xff]  ;;  %v583_v53 = vld [vmem:[#allocation2 + $0x40] sm:$0xff] }
  0xd9   : > { %1066 = vmatpush3.bf16.msra.mxu0 %v1063_v10  ;;  %1097 = vmatpush3.bf16.msra.mxu1 %v1063_v10  ;;  %v580_v62 = vld [vmem:[#allocation2 + $0x28] sm:$0xff]  ;;  %v586_v63 = vld [vmem:[#allocation2 + $0x58] sm:$0xff]  ;;  %v579_v0 = vld [vmem:[#allocation2 + $0x20] sm:$0xff] }
  0xda   : > { %1068 = vmatprep.subr.bf16.mxu0 %v1067_v15  ;;  %1090 = vmatprep.subr.bf16.mxu1 %v1067_v15  ;;  %v585_v1 = vld [vmem:[#allocation2 + $0x50] sm:$0xff]  ;;  %v957_v16 = vld [vmem:[#allocation10] ss:$0 sm:$0xff] (!%p956_p10)  ;;  %v959_v25 = vld [vmem:[#allocation13 + $0x1] ss:$0 sm:$0xff] (!%p956_p10) }
  0xdd   : > { %1070 = vmatpush3.bf16.msra.mxu0 %v1067_v15  ;;  %1098 = vmatpush3.bf16.msra.mxu1 %v1067_v15 }
  0xde   : > { %1072 = vmatprep.subr.bf16.mxu0 %v1071_v18  ;;  %1091 = vmatprep.subr.bf16.mxu1 %v1071_v18 }
  0xe1   : > { %1074 = vmatpush3.bf16.msra.mxu0 %v1071_v18  ;;  %1099 = vmatpush3.bf16.msra.mxu1 %v1071_v18 }
  0xe2   : > { %1076 = vmatprep.subr.bf16.mxu0 %v1075_v21  ;;  %1092 = vmatprep.subr.bf16.mxu1 %v1075_v21 }
  0xe5   : > { %1078 = vmatpush3.bf16.msra.mxu0 %v1075_v21  ;;  %1100 = vmatpush3.bf16.msra.mxu1 %v1075_v21 }
  0xe6   : > { %1080 = vmatprep.subr.bf16.mxu0 %v1079_v24  ;;  %1093 = vmatprep.subr.bf16.mxu1 %v1079_v24 }
  0xe9   : > { %1082 = vmatpush3.bf16.msra.mxu0 %v1079_v24  ;;  %1101 = vmatpush3.bf16.msra.mxu1 %v1079_v24  ;;  %v958_v24 = vld [vmem:[#allocation13] ss:$0 sm:$0xff] (!%p956_p10) }
  0xea   : > { %1084 = vmatprep.subr.bf16.mxu0 %v1083_v27  ;;  %1094 = vmatprep.subr.bf16.mxu1 %v1083_v27 }
  0xed   : > { %1086 = vmatpush3.bf16.msra.mxu0 %v1083_v27  ;;  %1102 = vmatpush3.bf16.msra.mxu1 %v1083_v27 }
  0xf0   : > { %1038 = vmatmul.mubr.f32.vlgmr.msra.gmra.mrb[0].mxu0 %v423_v28  ;;  %1047 = vmatmul.mubr.f32.vlgmr.msra.gmra.mrb[0].mxu1 %v429_v29 }
  0xf1   : > { %1040 = vmatprep.mubr.f32.mxu0 %v424_v30  ;;  %1049 = vmatprep.mubr.f32.mxu1 %v430_v31  ;;  %v960_v30 = vld [vmem:[#allocation13 + $0x2] ss:$0 sm:$0xff] (!%p956_p10) }
  0xf4   : > { %1041 = vmatmul.mubr.f32.gmra.mrb[2].mxu0 %v425_v32  ;;  %1050 = vmatmul.mubr.f32.gmra.mrb[2].mxu1 %v431_v33  ;;  %v961_v33 = vld [vmem:[#allocation13 + $0x3] ss:$0 sm:$0xff] (!%p956_p10) }
  0xf5   : > { %1043 = vmatprep.mubr.f32.mxu0 %v426_v34  ;;  %1052 = vmatprep.mubr.f32.mxu1 %v432_v35 }
  0xf8   : > { %1044 = vmatmul.mubr.f32.gmra.mrb[4].mxu0 %v427_v36  ;;  %1053 = vmatmul.mubr.f32.gmra.mrb[4].mxu1 %v433_v37  ;;  %v962_v36 = vld [vmem:[#allocation13 + $0x4] ss:$0 sm:$0xff] (!%p956_p10) }
 0x1c3   : > { %v1039_v42 = vpop.f32.mrb[0].mxu0  ;;  %v1048_v43 = vpop.f32.mrb[0].mxu1 }
 0x1c4   : > { %v588_v44 = vadd.f32 %v1039_v42, %v576_v38  ;;  %v594_v45 = vadd.f32 %v1048_v43, %v582_v39  ;;  %v516_v46 = vpop.f32.mrb[1].mxu0  ;;  %v546_v47 = vpop.f32.mrb[1].mxu1 }
 0x1c5   : > { %v587_v48 = vadd.f32 %v575_v40, %v516_v46  ;;  %v593_v49 = vadd.f32 %v581_v41, %v546_v47  ;;  %v963_v46 = vld [vmem:[#allocation13 + $0x5] ss:$0 sm:$0xff] (!%p956_p10) }
 0x1c6   : > { %601 = vst.msk [vmem:[#allocation2 + $0x8] sm:$0xff] %vm599_vm1, %v588_v44  ;;  %607 = vst.msk [vmem:[#allocation2 + $0x38] sm:$0xff] %vm599_vm1, %v594_v45 }
 0x1c7   : > { %600 = vst.msk [vmem:[#allocation2] sm:$0xff] %vm599_vm1, %v587_v48  ;;  %606 = vst.msk [vmem:[#allocation2 + $0x30] sm:$0xff] %vm599_vm1, %v593_v49  ;;  %v1042_v54 = vpop.f32.mrb[2].mxu0  ;;  %v1051_v55 = vpop.f32.mrb[2].mxu1 }
 0x1c8   : > { %v590_v56 = vadd.f32 %v1042_v54, %v578_v50  ;;  %v596_v57 = vadd.f32 %v1051_v55, %v584_v51  ;;  %v526_v58 = vpop.f32.mrb[3].mxu0  ;;  %v556_v59 = vpop.f32.mrb[3].mxu1 }
 0x1c9   : > { %v589_v60 = vadd.f32 %v577_v52, %v526_v58  ;;  %v595_v61 = vadd.f32 %v583_v53, %v556_v59  ;;  %615 = sbr.rel (%p956_p10) target bundleno = 646 (0x286), region = 80  ;;  %v964_v52 = vld [vmem:[#allocation13 + $0x6] ss:$0 sm:$0xff] (!%p956_p10)  ;;  %v965_v59 = vld [vmem:[#allocation13 + $0x7] ss:$0 sm:$0xff] (!%p956_p10) }
 0x1ca   : > { %603 = vst.msk [vmem:[#allocation2 + $0x18] sm:$0xff] %vm599_vm1, %v590_v56  ;;  %609 = vst.msk [vmem:[#allocation2 + $0x48] sm:$0xff] %vm599_vm1, %v596_v57 }
 0x1cb   : > { %602 = vst.msk [vmem:[#allocation2 + $0x10] sm:$0xff] %vm599_vm1, %v589_v60  ;;  %608 = vst.msk [vmem:[#allocation2 + $0x40] sm:$0xff] %vm599_vm1, %v595_v61  ;;  %v1045_v2 = vpop.f32.mrb[4].mxu0  ;;  %v1054_v3 = vpop.f32.mrb[4].mxu1 }
 0x1cc   : > { %v592_v4 = vadd.f32 %v1045_v2, %v580_v62  ;;  %v598_v5 = vadd.f32 %v1054_v3, %v586_v63  ;;  %v536_v6 = vpop.f32.mrb[5].mxu0  ;;  %v566_v7 = vpop.f32.mrb[5].mxu1 }
 0x1cd   : > { %v591_v8 = vadd.f32 %v579_v0, %v536_v6  ;;  %v597_v9 = vadd.f32 %v585_v1, %v566_v7  ;;  %v617_v11 = vld [vmem:[#allocation2 + $0x8] sm:$0xff] (!%p956_p10)  ;;  %v623_v31 = vld [vmem:[#allocation2 + $0x38] sm:$0xff] (!%p956_p10)  ;;  %v966_v1 = vld [vmem:[#allocation13 + $0x8] ss:$0 sm:$0xff] (!%p956_p10) }
 0x1ce   : > { %605 = vst.msk [vmem:[#allocation2 + $0x28] sm:$0xff] %vm599_vm1, %v592_v4  ;;  %611 = vst.msk [vmem:[#allocation2 + $0x58] sm:$0xff] %vm599_vm1, %v598_v5  ;;  %v616_v10 = vld [vmem:[#allocation2] sm:$0xff] (!%p956_p10)  ;;  %v636_v18 = vadd.f32 (!%p956_p10), %v957_v16, %v617_v11  ;;  %v622_v21 = vld [vmem:[#allocation2 + $0x30] sm:$0xff] (!%p956_p10)  ;;  %v642_v40 = vadd.f32 (!%p956_p10), %v957_v16, %v623_v31 }
 0x1cf   : > { %604 = vst.msk [vmem:[#allocation2 + $0x20] sm:$0xff] %vm599_vm1, %v591_v8  ;;  %610 = vst.msk [vmem:[#allocation2 + $0x50] sm:$0xff] %vm599_vm1, %v597_v9  ;;  %v635_v17 = vadd.f32 (!%p956_p10), %v957_v16, %v616_v10  ;;  %v641_v32 = vadd.f32 (!%p956_p10), %v957_v16, %v622_v21  ;;  %v967_v7 = vld [vmem:[#allocation13 + $0x9] ss:$0 sm:$0xff] (!%p956_p10)  ;;  %v970_v31 = vld [vmem:[#allocation12] ss:$0 sm:$0xff] (!%p956_p10) }
 0x1d0   : > { %v648_v27 = vmax.f32 %v636_v18, 0.0  ;;  %v654_v55 = vmax.f32 %v642_v40, 0.0  ;;  %v969_v18 = vld [vmem:[#allocation13 + $0xb] ss:$0 sm:$0xff] }
 0x1d1   : > { %v619_v13 = vld [vmem:[#allocation2 + $0x18] sm:$0xff]  ;;  %v647_v26 = vmax.f32 %v635_v17, 0.0  ;;  %v625_v43 = vld [vmem:[#allocation2 + $0x48] sm:$0xff]  ;;  %v653_v45 = vmax.f32 %v641_v32, 0.0 }
 0x1d2   : > { %v618_v12 = vld [vmem:[#allocation2 + $0x10] sm:$0xff]  ;;  %v638_v20 = vadd.f32 %v957_v16, %v619_v13  ;;  %v624_v34 = vld [vmem:[#allocation2 + $0x40] sm:$0xff]  ;;  %v744_v38 = vmul.f32 %v959_v25, %v648_v27  ;;  %v644_v54 = vadd.f32 %v957_v16, %v625_v43  ;;  %v750_v5 = vmul.f32 %v965_v59, %v654_v55 }
 0x1d3   : > { %v637_v19 = vadd.f32 %v957_v16, %v618_v12  ;;  %v743_v37 = vmul.f32 %v958_v24, %v647_v26  ;;  %v643_v44 = vadd.f32 %v957_v16, %v624_v34  ;;  %v749_v63 = vmul.f32 %v964_v52, %v653_v45  ;;  %v968_v12 = vld [vmem:[#allocation13 + $0xa] ss:$0 sm:$0xff] }
 0x1d4   : > { %v650_v29 = vmax.f32 %v638_v20, 0.0  ;;  %v756_v49 = vsel %vm599_vm1, %v744_v38, 0.0  ;;  %v656_v4 = vmax.f32 %v644_v54, 0.0  ;;  %v768_v17 = vsel %vm599_vm1, %v750_v5, 0.0 }
 0x1d5   : > { %v621_v15 = vld [vmem:[#allocation2 + $0x28] sm:$0xff]  ;;  %v649_v28 = vmax.f32 %v637_v19, 0.0  ;;  %v755_v48 = vsel %vm599_vm1, %v743_v37, 0.0  ;;  %v627_v58 = vld [vmem:[#allocation2 + $0x58] sm:$0xff]  ;;  %v655_v62 = vmax.f32 %v643_v44, 0.0  ;;  %v766_v11 = vsel %vm599_vm1, %v749_v63, 0.0 }
 0x1d6   : > { %v620_v14 = vld [vmem:[#allocation2 + $0x20] sm:$0xff]  ;;  %v640_v23 = vadd.f32 %v957_v16, %v621_v15  ;;  %v746_v42 = vmul.f32 %v961_v33, %v650_v29  ;;  %v626_v51 = vld [vmem:[#allocation2 + $0x50] sm:$0xff]  ;;  %v757_v53 = vadd.f32 %v756_v49, %v755_v48  ;;  %v646_v3 = vadd.f32 %v957_v16, %v627_v58 }
 0x1d7   : > { %v639_v22 = vadd.f32 %v957_v16, %v620_v14  ;;  %v745_v39 = vmul.f32 %v960_v30, %v649_v28  ;;  %v645_v61 = vadd.f32 %v957_v16, %v626_v51  ;;  %v751_v10 = vmul.f32 %v966_v1, %v655_v62  ;;  %v781_v30 = vld [vmem:[#allocation4] sm:$0xff] }
 0x1d8   : > { %v652_v41 = vmax.f32 %v640_v23, 0.0  ;;  %v760_v57 = vsel %vm599_vm1, %v746_v42, 0.0  ;;  %v658_v14 = vmax.f32 %v646_v3, 0.0  ;;  %v752_v15 = vmul.f32 %v967_v7, %v656_v4 }
 0x1d9   : > { %v651_v35 = vmax.f32 %v639_v22, 0.0  ;;  %v758_v50 = vsel %vm599_vm1, %v745_v39, 0.0  ;;  %v657_v9 = vmax.f32 %v645_v61, 0.0  ;;  %v770_v16 = vsel %vm599_vm1, %v751_v10, 0.0 }
 0x1da   : > { %v748_v56 = vmul.f32 %v963_v46, %v652_v41  ;;  %v759_v60 = vadd.f32 %v758_v50, %v757_v53  ;;  %v754_v22 = vmul.f32 %v969_v18, %v658_v14  ;;  %v772_v23 = vsel %vm599_vm1, %v752_v15, 0.0 }
 0x1db   : > { %v747_v47 = vmul.f32 %v962_v36, %v651_v35  ;;  %v753_v20 = vmul.f32 %v968_v12, %v657_v9  ;;  %v789_v33 = vmul.f32 %v970_v31, %v781_v30  ;;  %v971_v35 = vld [vmem:[#allocation3] ss:$0 sm:$0xff] }
 0x1dc   : > { %v761_v2 = vadd.f32 %v760_v57, %v759_v60  ;;  %v764_v6 = vsel %vm599_vm1, %v748_v56, 0.0  ;;  %v776_v27 = vsel %vm599_vm1, %v754_v22, 0.0 }
 0x1dd   : > { %v762_v0 = vsel %vm599_vm1, %v747_v47, 0.0  ;;  %v774_v25 = vsel %vm599_vm1, %v753_v20, 0.0 }
 0x1de   : > { %v763_v8 = vadd.f32 %v762_v0, %v761_v2 }
 0x1e0   : > { %v765_v13 = vadd.f32 %v764_v6, %v763_v8 }
 0x1e2   : > { %v767_v19 = vadd.f32 %v766_v11, %v765_v13 }
 0x1e4   : > { %v769_v21 = vadd.f32 %v768_v17, %v767_v19 }
 0x1e6   : > { %v771_v24 = vadd.f32 %v770_v16, %v769_v21 }
 0x1e8   : > { %v773_v26 = vadd.f32 %v772_v23, %v771_v24 }
 0x1ea   : > { %v775_v28 = vadd.f32 %v774_v25, %v773_v26 }
 0x1ec   : > { %v777_v29 = vadd.f32 %v776_v27, %v775_v28 }
 0x1ee   : > { %v778_v32 = vsel %vm599_vm1, %v777_v29, 0.0 }
 0x1ef   : > { %779 = vadd.xlane.f32.xlu0 %v778_v32 }
 0x1f3   : > { %790 = vadd.xlane.f32.xlu0 %v789_v33 }
 0x27c   : > { %v780_v34 = vpop.xlane.xlu0 %779 }
 0x280   : > { %v791_v36 = vpop.xlane.xlu0 %790 }
 0x281   : > { %v792_v37 = vadd.f32 %v791_v36, %v780_v34 }
 0x283   : > { %v800_v38 = vadd.f32 %v971_v35, %v792_v37 }
 0x285   : > { %802 = vst.msk [vmem:[#allocation15] sm:$0xff] %vm801_vm2, %v800_v38 }
 0x286 PF: > { %p1158_p12 = scmp.eq.s32.totalorder %s1570_s6, 1  ;;  %s1497_s29 = smov [#allocation15]  }
 0x287   : > { %s812_s9 = sshll.u32 %s1497_s29, 4  ;;  %s813_s9 = int_to_ptr.vmem [resolvable:$true] %s812_s9 }
 0x288   : > { %s1391_s24 = scalar_lea.vmem %s813_s9, 128  ;;  %p1398_p7 = scmp.lt.s32.totalorder %s813_s9, %s813_s9 }
 0x289   : > { %p1392_p3 = scmp.ne.s32.totalorder %s813_s9, %s1391_s24  ;;  %p1399_p9 = scmp.lt.s32.totalorder %s1391_s24, %s1391_s24 }
 0x28b   : > { %p1393_p5 = pnand %p1392_p3, %p1158_p12  ;;  %p1400_p11 = por %p1399_p9, %p1398_p7 }
 0x28d   : > { %p1394_p8 = pneg %p1393_p5 }
 0x28f   : > { %p1401_p13 = pnand %p1400_p11, %p1394_p8 }
 0x291   : > { %1404 = shalt.err (!%p1401_p13)
}
 0x292   : > { %s1405_s16 = scalar_lea.hbm %s1903_s7, 128 }
 0x293   : > { %p1406_p0 = scmp.ne.s32.totalorder %s1903_s7, %s1405_s16  ;;  %p1411_p1 = scmp.lt.u32.totalorder %s1405_s16, %s1903_s7 }
 0x295   : > { %p1407_p2 = pnand %p1406_p0, %p1158_p12 }
 0x297   : > { %p1408_p6 = pneg %p1407_p2 }
 0x299   : > { %p1413_p4 = pnand %p1411_p1, %p1408_p6 }
 0x29b   : > { %1416 = shalt.err (!%p1413_p4)
}
 0x29c   : > { %1126 = dma.vmem_to_hbm [thread:$0]  (%p1158_p12), %s813_s9, 128, %s1903_s7, [#allocation6]  }
 0x29d   : > { %1458 = dma.done.wait (%p1158_p12), [#allocation6], 128  }
 0x29e   : > { %1460 = vsyncadd (%p1158_p12), [#allocation6], 4294967168 }
 0x29f PF: > { %s26_s8 = sadd.s32 1, %s1483_s8   ;;  %s1942_s15 = sld [smem:[#allocation22_spill]] }
 0x2a0   : > { %p23_p10 = scmp.ge.s32.totalorder %s26_s8, 4   ;;  %s1943_s3 = sld [smem:[#allocation21_spill]] }
 0x2a1   : > { %s1944_s26 = smov %s1467_s27  ;;  %s1945_s27 = smov %s1471_s28 }
 0x2a2   : > { %s1947_s29 = smov %s1479_s30  ;;  %25 = sbr.rel (!%p23_p10) target bundleno = 11 (0xb), region = 123 }
 0x2a5   : > { %s1946_s28 = smov %s1942_s15 }
 0x2a6   : > { %s1948_s30 = smov %s1943_s3 }
 0x2a9   :  { %825 = vsyncpa [#allocation5], 1 }
 0x2aa   :  { %827 = vsyncpa [#allocation5 + $0x1], 1 }
 0x2ab   :  { %828 = vsyncpa [#allocation8], 1 }
 0x2ac   :  { %830 = vsyncpa [#allocation8 + $0x1], 1 }
 0x2ad   :  { %831 = vsyncpa [#allocation11], 1 }
 0x2ae   :  { %832 = vsyncpa [#allocation14], 1 }
 0x2af   :  { %833 = vsyncpa [#allocation6], 1 }
 0x2b0   :  { %835 = vsyncpa [#allocation6 + $0x1], 1 }

</bundles_post_ra>
